<compile_context>
chip_gen: v7x
topology: tpu7x:2x2x1
jax: 0.10.0
libtpu: 0.0.40
codegen_flags: <defaults>
</compile_context>

<pallas_src>
import functools
import math

import jax
import jax.numpy as jnp
from jax import lax
from jax.experimental import pallas as pl
from jax.experimental.pallas import tpu as pltpu


def _attention_kernel(x_ref, wqkv_ref, wproj_ref, bproj_ref, o_ref,
                      head_out_ref, *, num_heads):
    # x_ref:        (1, N, C) bf16 tokens for this batch element
    # wqkv_ref:     (C, 3C)   bf16, (in, out) layout, Q columns pre-scaled
    # wproj_ref:    (C, C)    bf16, (in, out) layout
    # bproj_ref:    (1, C)    f32 projection bias
    # o_ref:        (1, N, C) output (input dtype)
    # head_out_ref: (N, C)    bf16 VMEM scratch: per-head attn@v lane slabs
    _, N, C = x_ref.shape
    hd = C // num_heads

    # QKV projection for all N tokens of this batch element (bf16 MXU, f32
    # accumulate), then one down-cast so every per-head slice is already an
    # MXU-native bf16 operand and the live intermediate is half the size.
    qkv = jnp.dot(x_ref[0], wqkv_ref[...],
                  preferred_element_type=jnp.float32).astype(jnp.bfloat16)  # (N, 3C)

    # TODO(synk): for hd=64 heads process head pairs (128-wide lane slices),
    # and flash-tile over (query, kv) blocks with online softmax once N grows
    # large, to bound VMEM and add a second parallel grid axis.
    for h in range(num_heads):
        # qkv column layout along lanes is [q(h0..H-1) | k(h0..) | v(h0..)],
        # hd-wide blocks, matching reshape(B,N,3,H,hd).permute(2,0,3,1,4).
        q_h = qkv[:, h * hd:(h + 1) * hd]                    # (N, hd) bf16, pre-scaled
        k_h = qkv[:, C + h * hd:C + (h + 1) * hd]            # (N, hd) bf16
        v_h = qkv[:, 2 * C + h * hd:2 * C + (h + 1) * hd]    # (N, hd) bf16

        # q @ k^T without an explicit transpose: contract the hd axes.
        s = lax.dot_general(q_h, k_h,
                            dimension_numbers=(((1,), (1,)), ((), ())),
                            preferred_element_type=jnp.float32)   # (N, N) f32

        # Softmax in f32; approx reciprocal runs on the otherwise-idle EUP slot.
        s = s - jnp.max(s, axis=-1, keepdims=True)
        p = jnp.exp(s)
        attn = p * pl.reciprocal(jnp.sum(p, axis=-1, keepdims=True), approx=True)
        # attn_drop / proj_drop are identity in eval mode (p = 0.0 default).

        o_h = jnp.dot(attn.astype(jnp.bfloat16), v_h,
                      preferred_element_type=jnp.float32)          # (N, hd) f32
        # Write this head's output into its lane slab; the (N, N) scores die
        # here each iteration, so the Python head loop carries no f32 chain.
        head_out_ref[:, h * hd:(h + 1) * hd] = o_h.astype(head_out_ref.dtype)

    # Single full-width output projection (K = C) + bias, f32 accumulation.
    out = jnp.dot(head_out_ref[...], wproj_ref[...],
                  preferred_element_type=jnp.float32)              # (N, C) f32
    out = out + bproj_ref[...].astype(jnp.float32)                 # (1,C) bcast
    o_ref[0] = out.astype(o_ref.dtype)


def attention_pallas(x, w_qkv, w_proj, b_proj, *, num_heads, qk_scale=None):
    """x: (B, N, C); w_qkv: (C, 3C) (in,out); w_proj: (C, C) (in,out); b_proj: (C,)."""
    B, N, C = x.shape
    hd = C // num_heads
    scale = qk_scale if qk_scale is not None else hd ** (-0.5)

    # Fold the softmax scale into the Q columns of the QKV weight (host side):
    # x @ Wq * scale == x @ (Wq * scale).  Then cast MXU operands to bf16.
    w_qkv_scaled = w_qkv.astype(jnp.float32).at[:, :C].multiply(scale)
    w_qkv_bf = w_qkv_scaled.astype(jnp.bfloat16)
    w_proj_bf = w_proj.astype(jnp.bfloat16)
    x_bf = x.astype(jnp.bfloat16)
    b_proj2d = b_proj.reshape(1, C).astype(jnp.float32)

    kernel = functools.partial(_attention_kernel, num_heads=num_heads)

    out = pl.pallas_call(
        kernel,
        out_shape=jax.ShapeDtypeStruct((B, N, C), x.dtype),
        grid_spec=pltpu.PrefetchScalarGridSpec(
            num_scalar_prefetch=0,
            # One batch element per grid step; "parallel" lets megacore / v7x
            # shard the batch across TensorCores (>=2 steps whenever B >= 2).
            grid=(B,),
            in_specs=[
                # Last two block dims equal the full (N, C) extents, so any N
                # (e.g. ViT's 197) satisfies the (8,128) tiling rule.
                pl.BlockSpec((1, N, C), lambda b: (b, 0, 0)),
                # Grid-invariant weights: constant index_map -> fetched once.
                pl.BlockSpec((C, 3 * C), lambda b: (0, 0)),
                pl.BlockSpec((C, C), lambda b: (0, 0)),
                pl.BlockSpec((1, C), lambda b: (0, 0)),
            ],
            out_specs=pl.BlockSpec((1, N, C), lambda b: (b, 0, 0)),
            scratch_shapes=[pltpu.VMEM((N, C), jnp.bfloat16)],
        ),
        compiler_params=pltpu.CompilerParams(
            dimension_semantics=("parallel",),
            # Leave headroom on v7x (64 MiB physical VMEM); at ViT scale the
            # bf16 working set (weights double-buffered + per-batch blocks +
            # scratch) fits comfortably under this.
            vmem_limit_bytes=48 * 1024 * 1024),
    )(x_bf, w_qkv_bf, w_proj_bf, b_proj2d)

    return out


def attention_ref(x, w_qkv, w_proj, b_proj, *, num_heads):
    """Pure-JAX f32 reference mirroring the PyTorch forward."""
    B, N, C = x.shape
    hd = C // num_heads
    scale = hd ** (-0.5)
    qkv = x @ w_qkv                                        # (B, N, 3C)
    qkv = qkv.reshape(B, N, 3, num_heads, hd).transpose(2, 0, 3, 1, 4)
    q, k, v = qkv[0], qkv[1], qkv[2]                       # (B, H, N, hd)
    attn = jnp.einsum("bhqd,bhkd->bhqk", q, k) * scale
    attn = jax.nn.softmax(attn, axis=-1)
    out = jnp.einsum("bhqk,bhkd->bhqd", attn, v)           # (B, H, N, hd)
    out = out.transpose(0, 2, 1, 3).reshape(B, N, C)
    return out @ w_proj + b_proj


if __name__ == "__main__":
    # Small, module-consistent shapes: B=2, N=8 tokens, C=32 channels, 4 heads.
    B, N, C = 2, 8, 32
    num_heads = 4

    key = jax.random.PRNGKey(0)
    kx, kq, kp, kb = jax.random.split(key, 4)

    x = jax.random.normal(kx, (B, N, C), dtype=jnp.float32)

    # Deterministic nn.Linear-style init (uniform bound 1/sqrt(fan_in)), stored
    # pre-transposed to (in, out).  qkv_bias=False -> no qkv bias.
    bound = 1.0 / math.sqrt(C)
    w_qkv = jax.random.uniform(kq, (C, 3 * C), minval=-bound, maxval=bound,
                               dtype=jnp.float32)
    w_proj = jax.random.uniform(kp, (C, C), minval=-bound, maxval=bound,
                                dtype=jnp.float32)
    b_proj = jax.random.uniform(kb, (C,), minval=-bound, maxval=bound,
                                dtype=jnp.float32)

    out = attention_pallas(x, w_qkv, w_proj, b_proj, num_heads=num_heads)
    out = jax.block_until_ready(out)

    ref = attention_ref(x, w_qkv, w_proj, b_proj, num_heads=num_heads)
    assert out.shape == (B, N, C)
    # bf16 MXU operands + approx (EUP) reciprocal in the softmax denominator
    # give ~1e-2-level absolute error vs. the f32 reference at these scales.
    err = jnp.max(jnp.abs(out - ref))
    assert jnp.allclose(out, ref, atol=5e-2, rtol=5e-2), f"max abs err {err}"

    print("KERNEL_OK")
</pallas_src>

<mosaic_0001>
module attributes {stable_mosaic.version = 11 : i64} {
  func.func @_attention_kernel(%arg0: i32, %arg1: memref<1x8x32xbf16, #tpu.memory_space<vmem>>, %arg2: memref<32x96xbf16, #tpu.memory_space<vmem>>, %arg3: memref<32x32xbf16, #tpu.memory_space<vmem>>, %arg4: memref<1x32xf32, #tpu.memory_space<vmem>>, %arg5: memref<1x8x32xf32, #tpu.memory_space<vmem>>, %arg6: memref<8x32xbf16, #tpu.memory_space<vmem>>) attributes {dimension_semantics = [#tpu.dimension_semantics<parallel>], iteration_bounds = array<i64: 2>, scalar_prefetch = 0 : i64, scratch_operands = 1 : i64, tpu.core_type = #tpu.core_type<tc>, window_params = [{transform_indices = @transform_0, window_bounds = array<i64: 1, 8, 32>}, {pipeline_mode = #tpu.pipeline_mode<synchronous>, transform_indices = @transform_1, window_bounds = array<i64: 32, 96>}, {pipeline_mode = #tpu.pipeline_mode<synchronous>, transform_indices = @transform_2, window_bounds = array<i64: 32, 32>}, {pipeline_mode = #tpu.pipeline_mode<synchronous>, transform_indices = @transform_3, window_bounds = array<i64: 1, 32>}, {transform_indices = @transform_4, window_bounds = array<i64: 1, 8, 32>}]} {
    %c0 = arith.constant 0 : index
    %c0_0 = arith.constant 0 : index
    %c0_1 = arith.constant 0 : index
    %0 = vector.load %arg1[%c0, %c0_0, %c0_1] : memref<1x8x32xbf16, #tpu.memory_space<vmem>>, vector<1x8x32xbf16>
    %1 = vector.shape_cast %0 : vector<1x8x32xbf16> to vector<8x32xbf16>
    %c0_2 = arith.constant 0 : index
    %c0_3 = arith.constant 0 : index
    %2 = vector.load %arg2[%c0_2, %c0_3] : memref<32x96xbf16, #tpu.memory_space<vmem>>, vector<32x96xbf16>
    %cst = arith.constant dense<0.000000e+00> : vector<8x96xf32>
    %3 = tpu.matmul %1, %2, %cst {dimension_numbers = #tpu.dot_dimension_numbers<[1], [0], [0], [1], [0, 0, 1, 1], [], []>} : vector<8x32xbf16>, vector<32x96xbf16>, vector<8x96xf32> -> vector<8x96xf32>
    %4 = arith.truncf %3 : vector<8x96xf32> to vector<8x96xbf16>
    %5 = vector.extract_strided_slice %4 {offsets = [0, 0], sizes = [8, 8], strides = [1, 1]} : vector<8x96xbf16> to vector<8x8xbf16>
    %6 = vector.extract_strided_slice %4 {offsets = [0, 32], sizes = [8, 8], strides = [1, 1]} : vector<8x96xbf16> to vector<8x8xbf16>
    %7 = vector.extract_strided_slice %4 {offsets = [0, 64], sizes = [8, 8], strides = [1, 1]} : vector<8x96xbf16> to vector<8x8xbf16>
    %cst_4 = arith.constant dense<0.000000e+00> : vector<8x8xf32>
    %8 = tpu.matmul %5, %6, %cst_4 {dimension_numbers = #tpu.dot_dimension_numbers<[1], [1], [0], [0], [0, 0, 1, 0], [], []>} : vector<8x8xbf16>, vector<8x8xbf16>, vector<8x8xf32> -> vector<8x8xf32>
    %cst_5 = arith.constant dense<0xFF800000> : vector<8xf32>
    %9 = vector.multi_reduction <maximumf>, %8, %cst_5 [1] : vector<8x8xf32> to vector<8xf32>
    %10 = vector.shape_cast %9 : vector<8xf32> to vector<8x1xf32>
    %11 = vector.broadcast %10 : vector<8x1xf32> to vector<8x8xf32>
    %12 = arith.subf %8, %11 : vector<8x8xf32>
    %13 = math.exp %12 : vector<8x8xf32>
    %cst_6 = arith.constant dense<0.000000e+00> : vector<8xf32>
    %14 = vector.multi_reduction <add>, %13, %cst_6 [1] : vector<8x8xf32> to vector<8xf32>
    %15 = vector.shape_cast %14 : vector<8xf32> to vector<8x1xf32>
    %16 = tpu.reciprocal %15 {approx = true} : vector<8x1xf32> -> vector<8x1xf32>
    %17 = vector.broadcast %16 : vector<8x1xf32> to vector<8x8xf32>
    %18 = arith.mulf %13, %17 : vector<8x8xf32>
    %19 = arith.truncf %18 : vector<8x8xf32> to vector<8x8xbf16>
    %cst_7 = arith.constant dense<0.000000e+00> : vector<8x8xf32>
    %20 = tpu.matmul %19, %7, %cst_7 {dimension_numbers = #tpu.dot_dimension_numbers<[1], [0], [0], [1], [0, 0, 1, 1], [], []>} : vector<8x8xbf16>, vector<8x8xbf16>, vector<8x8xf32> -> vector<8x8xf32>
    %21 = arith.truncf %20 : vector<8x8xf32> to vector<8x8xbf16>
    %c0_8 = arith.constant 0 : index
    %c0_9 = arith.constant 0 : index
    %22 = vector.load %arg6[%c0_8, %c0_9] : memref<8x32xbf16, #tpu.memory_space<vmem>>, vector<8x8xbf16>
    tpu.vector_store %arg6[%c0_8, %c0_9], %21 {strides = array<i32>} : memref<8x32xbf16, #tpu.memory_space<vmem>>, vector<8x8xbf16>,
    %23 = vector.extract_strided_slice %4 {offsets = [0, 8], sizes = [8, 8], strides = [1, 1]} : vector<8x96xbf16> to vector<8x8xbf16>
    %24 = vector.extract_strided_slice %4 {offsets = [0, 40], sizes = [8, 8], strides = [1, 1]} : vector<8x96xbf16> to vector<8x8xbf16>
    %25 = vector.extract_strided_slice %4 {offsets = [0, 72], sizes = [8, 8], strides = [1, 1]} : vector<8x96xbf16> to vector<8x8xbf16>
    %cst_10 = arith.constant dense<0.000000e+00> : vector<8x8xf32>
    %26 = tpu.matmul %23, %24, %cst_10 {dimension_numbers = #tpu.dot_dimension_numbers<[1], [1], [0], [0], [0, 0, 1, 0], [], []>} : vector<8x8xbf16>, vector<8x8xbf16>, vector<8x8xf32> -> vector<8x8xf32>
    %cst_11 = arith.constant dense<0xFF800000> : vector<8xf32>
    %27 = vector.multi_reduction <maximumf>, %26, %cst_11 [1] : vector<8x8xf32> to vector<8xf32>
    %28 = vector.shape_cast %27 : vector<8xf32> to vector<8x1xf32>
    %29 = vector.broadcast %28 : vector<8x1xf32> to vector<8x8xf32>
    %30 = arith.subf %26, %29 : vector<8x8xf32>
    %31 = math.exp %30 : vector<8x8xf32>
    %cst_12 = arith.constant dense<0.000000e+00> : vector<8xf32>
    %32 = vector.multi_reduction <add>, %31, %cst_12 [1] : vector<8x8xf32> to vector<8xf32>
    %33 = vector.shape_cast %32 : vector<8xf32> to vector<8x1xf32>
    %34 = tpu.reciprocal %33 {approx = true} : vector<8x1xf32> -> vector<8x1xf32>
    %35 = vector.broadcast %34 : vector<8x1xf32> to vector<8x8xf32>
    %36 = arith.mulf %31, %35 : vector<8x8xf32>
    %37 = arith.truncf %36 : vector<8x8xf32> to vector<8x8xbf16>
    %cst_13 = arith.constant dense<0.000000e+00> : vector<8x8xf32>
    %38 = tpu.matmul %37, %25, %cst_13 {dimension_numbers = #tpu.dot_dimension_numbers<[1], [0], [0], [1], [0, 0, 1, 1], [], []>} : vector<8x8xbf16>, vector<8x8xbf16>, vector<8x8xf32> -> vector<8x8xf32>
    %39 = arith.truncf %38 : vector<8x8xf32> to vector<8x8xbf16>
    %c0_14 = arith.constant 0 : index
    %c8 = arith.constant 8 : index
    %40 = vector.load %arg6[%c0_14, %c8] : memref<8x32xbf16, #tpu.memory_space<vmem>>, vector<8x8xbf16>
    tpu.vector_store %arg6[%c0_14, %c8], %39 {strides = array<i32>} : memref<8x32xbf16, #tpu.memory_space<vmem>>, vector<8x8xbf16>,
    %41 = vector.extract_strided_slice %4 {offsets = [0, 16], sizes = [8, 8], strides = [1, 1]} : vector<8x96xbf16> to vector<8x8xbf16>
    %42 = vector.extract_strided_slice %4 {offsets = [0, 48], sizes = [8, 8], strides = [1, 1]} : vector<8x96xbf16> to vector<8x8xbf16>
    %43 = vector.extract_strided_slice %4 {offsets = [0, 80], sizes = [8, 8], strides = [1, 1]} : vector<8x96xbf16> to vector<8x8xbf16>
    %cst_15 = arith.constant dense<0.000000e+00> : vector<8x8xf32>
    %44 = tpu.matmul %41, %42, %cst_15 {dimension_numbers = #tpu.dot_dimension_numbers<[1], [1], [0], [0], [0, 0, 1, 0], [], []>} : vector<8x8xbf16>, vector<8x8xbf16>, vector<8x8xf32> -> vector<8x8xf32>
    %cst_16 = arith.constant dense<0xFF800000> : vector<8xf32>
    %45 = vector.multi_reduction <maximumf>, %44, %cst_16 [1] : vector<8x8xf32> to vector<8xf32>
    %46 = vector.shape_cast %45 : vector<8xf32> to vector<8x1xf32>
    %47 = vector.broadcast %46 : vector<8x1xf32> to vector<8x8xf32>
    %48 = arith.subf %44, %47 : vector<8x8xf32>
    %49 = math.exp %48 : vector<8x8xf32>
    %cst_17 = arith.constant dense<0.000000e+00> : vector<8xf32>
    %50 = vector.multi_reduction <add>, %49, %cst_17 [1] : vector<8x8xf32> to vector<8xf32>
    %51 = vector.shape_cast %50 : vector<8xf32> to vector<8x1xf32>
    %52 = tpu.reciprocal %51 {approx = true} : vector<8x1xf32> -> vector<8x1xf32>
    %53 = vector.broadcast %52 : vector<8x1xf32> to vector<8x8xf32>
    %54 = arith.mulf %49, %53 : vector<8x8xf32>
    %55 = arith.truncf %54 : vector<8x8xf32> to vector<8x8xbf16>
    %cst_18 = arith.constant dense<0.000000e+00> : vector<8x8xf32>
    %56 = tpu.matmul %55, %43, %cst_18 {dimension_numbers = #tpu.dot_dimension_numbers<[1], [0], [0], [1], [0, 0, 1, 1], [], []>} : vector<8x8xbf16>, vector<8x8xbf16>, vector<8x8xf32> -> vector<8x8xf32>
    %57 = arith.truncf %56 : vector<8x8xf32> to vector<8x8xbf16>
    %c0_19 = arith.constant 0 : index
    %c16 = arith.constant 16 : index
    %58 = vector.load %arg6[%c0_19, %c16] : memref<8x32xbf16, #tpu.memory_space<vmem>>, vector<8x8xbf16>
    tpu.vector_store %arg6[%c0_19, %c16], %57 {strides = array<i32>} : memref<8x32xbf16, #tpu.memory_space<vmem>>, vector<8x8xbf16>,
    %59 = vector.extract_strided_slice %4 {offsets = [0, 24], sizes = [8, 8], strides = [1, 1]} : vector<8x96xbf16> to vector<8x8xbf16>
    %60 = vector.extract_strided_slice %4 {offsets = [0, 56], sizes = [8, 8], strides = [1, 1]} : vector<8x96xbf16> to vector<8x8xbf16>
    %61 = vector.extract_strided_slice %4 {offsets = [0, 88], sizes = [8, 8], strides = [1, 1]} : vector<8x96xbf16> to vector<8x8xbf16>
    %cst_20 = arith.constant dense<0.000000e+00> : vector<8x8xf32>
    %62 = tpu.matmul %59, %60, %cst_20 {dimension_numbers = #tpu.dot_dimension_numbers<[1], [1], [0], [0], [0, 0, 1, 0], [], []>} : vector<8x8xbf16>, vector<8x8xbf16>, vector<8x8xf32> -> vector<8x8xf32>
    %cst_21 = arith.constant dense<0xFF800000> : vector<8xf32>
    %63 = vector.multi_reduction <maximumf>, %62, %cst_21 [1] : vector<8x8xf32> to vector<8xf32>
    %64 = vector.shape_cast %63 : vector<8xf32> to vector<8x1xf32>
    %65 = vector.broadcast %64 : vector<8x1xf32> to vector<8x8xf32>
    %66 = arith.subf %62, %65 : vector<8x8xf32>
    %67 = math.exp %66 : vector<8x8xf32>
    %cst_22 = arith.constant dense<0.000000e+00> : vector<8xf32>
    %68 = vector.multi_reduction <add>, %67, %cst_22 [1] : vector<8x8xf32> to vector<8xf32>
    %69 = vector.shape_cast %68 : vector<8xf32> to vector<8x1xf32>
    %70 = tpu.reciprocal %69 {approx = true} : vector<8x1xf32> -> vector<8x1xf32>
    %71 = vector.broadcast %70 : vector<8x1xf32> to vector<8x8xf32>
    %72 = arith.mulf %67, %71 : vector<8x8xf32>
    %73 = arith.truncf %72 : vector<8x8xf32> to vector<8x8xbf16>
    %cst_23 = arith.constant dense<0.000000e+00> : vector<8x8xf32>
    %74 = tpu.matmul %73, %61, %cst_23 {dimension_numbers = #tpu.dot_dimension_numbers<[1], [0], [0], [1], [0, 0, 1, 1], [], []>} : vector<8x8xbf16>, vector<8x8xbf16>, vector<8x8xf32> -> vector<8x8xf32>
    %75 = arith.truncf %74 : vector<8x8xf32> to vector<8x8xbf16>
    %c0_24 = arith.constant 0 : index
    %c24 = arith.constant 24 : index
    %76 = vector.load %arg6[%c0_24, %c24] : memref<8x32xbf16, #tpu.memory_space<vmem>>, vector<8x8xbf16>
    tpu.vector_store %arg6[%c0_24, %c24], %75 {strides = array<i32>} : memref<8x32xbf16, #tpu.memory_space<vmem>>, vector<8x8xbf16>,
    %c0_25 = arith.constant 0 : index
    %c0_26 = arith.constant 0 : index
    %77 = vector.load %arg6[%c0_25, %c0_26] : memref<8x32xbf16, #tpu.memory_space<vmem>>, vector<8x32xbf16>
    %c0_27 = arith.constant 0 : index
    %c0_28 = arith.constant 0 : index
    %78 = vector.load %arg3[%c0_27, %c0_28] : memref<32x32xbf16, #tpu.memory_space<vmem>>, vector<32x32xbf16>
    %cst_29 = arith.constant dense<0.000000e+00> : vector<8x32xf32>
    %79 = tpu.matmul %77, %78, %cst_29 {dimension_numbers = #tpu.dot_dimension_numbers<[1], [0], [0], [1], [0, 0, 1, 1], [], []>} : vector<8x32xbf16>, vector<32x32xbf16>, vector<8x32xf32> -> vector<8x32xf32>
    %c0_30 = arith.constant 0 : index
    %c0_31 = arith.constant 0 : index
    %80 = vector.load %arg4[%c0_30, %c0_31] : memref<1x32xf32, #tpu.memory_space<vmem>>, vector<1x32xf32>
    %81 = vector.broadcast %80 : vector<1x32xf32> to vector<8x32xf32>
    %82 = arith.addf %79, %81 : vector<8x32xf32>
    %c0_32 = arith.constant 0 : index
    %c0_33 = arith.constant 0 : index
    %c0_34 = arith.constant 0 : index
    %83 = vector.load %arg5[%c0_32, %c0_33, %c0_34] : memref<1x8x32xf32, #tpu.memory_space<vmem>>, vector<1x8x32xf32>
    %84 = vector.shape_cast %83 : vector<1x8x32xf32> to vector<8x32xf32>
    %85 = vector.shape_cast %82 : vector<8x32xf32> to vector<1x8x32xf32>
    tpu.vector_store %arg5[%c0_32, %c0_33, %c0_34], %85 {strides = array<i32>} : memref<1x8x32xf32, #tpu.memory_space<vmem>>, vector<1x8x32xf32>,
    return
  }
  func.func @transform_0(%arg0: i32) -> (i32, i32, i32) {
    %c0_i32 = arith.constant 0 : i32
    %c0_i32_0 = arith.constant 0 : i32
    %c0_i32_1 = arith.constant 0 : i32
    return %arg0, %c0_i32, %c0_i32_0 : i32, i32, i32
  }
  func.func @transform_1(%arg0: i32) -> (i32, i32) {
    %c0_i32 = arith.constant 0 : i32
    %c0_i32_0 = arith.constant 0 : i32
    %c0_i32_1 = arith.constant 0 : i32
    return %c0_i32, %c0_i32_0 : i32, i32
  }
  func.func @transform_2(%arg0: i32) -> (i32, i32) {
    %c0_i32 = arith.constant 0 : i32
    %c0_i32_0 = arith.constant 0 : i32
    %c0_i32_1 = arith.constant 0 : i32
    return %c0_i32, %c0_i32_0 : i32, i32
  }
  func.func @transform_3(%arg0: i32) -> (i32, i32) {
    %c0_i32 = arith.constant 0 : i32
    %c0_i32_0 = arith.constant 0 : i32
    %c0_i32_1 = arith.constant 0 : i32
    return %c0_i32, %c0_i32_0 : i32, i32
  }
  func.func @transform_4(%arg0: i32) -> (i32, i32, i32) {
    %c0_i32 = arith.constant 0 : i32
    %c0_i32_0 = arith.constant 0 : i32
    %c0_i32_1 = arith.constant 0 : i32
    return %arg0, %c0_i32, %c0_i32_0 : i32, i32, i32
  }
}

</mosaic_0001>

<bundles_post_ra>
// kernel: tpu_custom_call.1
= control target key start
LH: loop header
LB: loop body
LE: loop exit
PB: predicated region body
PF: predicated region fallthrough
CT: control target
= control target key end

     0   :  { %9 = vsyncpa [#allocation4], 0  ;;  %s1686_s0 = inlined_call_operand.hbm [shape: bf16[2,8,32], index: 0, kind: input, shape index: {}]   ;;  %s1687_s1 = inlined_call_operand.hbm [shape: bf16[32,96], index: 1, kind: input, shape index: {}]   ;;  %s1688_s2 = inlined_call_operand.hbm [shape: bf16[32,32], index: 2, kind: input, shape index: {}]   ;;  %s1689_s3 = inlined_call_operand.vmem [shape: f32[1,32], index: 3, kind: input, shape index: {}]   ;;  %s1690_s4 = inlined_call_operand.hbm [shape: f32[2,8,32], index: 4, kind: output, shape index: {}]  }
   0x1   :  { %11 = vsyncpa [#allocation4 + $0x1], 0 }
   0x2   :  { %12 = vsyncpa [#allocation7], 0 }
   0x3   :  { %13 = vsyncpa [#allocation5], 0 }
   0x4   :  { %15 = vsyncpa [#allocation5 + $0x1], 0  ;;  %s1380_s15 = smov 0   ;;  %s1382_s16 = smov 0  }
   0x5   :  { %s1384_s17 = smov 0   ;;  %s1386_s18 = smov 0  }
   0x6 LB: > { %s1401_s19 = sadd.s32 4294967295, %s1331_s18   ;;  %s947_s20 = sadd.s32 4294967294, %s1331_s18   ;;  %s1331_s18 = sphi %s1386_s18, %s1710_s18   ;;  %s1327_s17 = sphi %s1384_s17, %s1709_s17   ;;  %s1323_s16 = sphi %s1382_s16, %s1708_s16   ;;  %s1319_s15 = sphi %s1380_s15, %s1707_s15  }
   0x7   : > { %p41_p0 = scmp.ne.s32.totalorder %s1323_s16, %s1319_s15  ;;  %p1691_p1 = scmp.eq.s32.totalorder %s1401_s19, 0 }
   0x8   : > { %p134_p3 = scmp.eq.s32.totalorder %s947_s20, 1  ;;  %p948_p5 = scmp.ge.s32.totalorder %s1331_s18, 1 }
   0x9   : > { %p1410_p4 = por %p1691_p1, %p41_p0  ;;  %p141_p7 = scmp.lt.s32.totalorder %s1331_s18, 3 }
   0xa   : > { %p1415_p6 = por %p134_p3, %p41_p0  ;;  %s1333_s24 = smov [#allocation6]  }
   0xb   : > { %s1694_s21 = scalar_select %p1410_p4, 1, 0 }
   0xc   : > { %s1695_s22 = scalar_select %p1415_p6, 1, 0 }
   0xd   : > { %p1420_p8 = pnand %p948_p5, %p141_p7  ;;  %s153_s25 = sshll.u32 %s1333_s24, 4  ;;  %s1424_s25 = int_to_ptr.vmem [resolvable:$true] %s153_s25 }
   0xe   : > { %s1334_s27 = smov [#allocation8]   ;;  %s1175_s5 = scalar_lea.hbm %s1687_s1, 256 }
   0xf   : > { %p1082_p9 = pneg %p1420_p8  ;;  %s166_s28 = sshll.u32 %s1334_s27, 4  ;;  %s1435_s28 = int_to_ptr.vmem [resolvable:$true] %s166_s28 }
  0x10   : > { %p1176_p12 = scmp.ne.s32.totalorder %s1687_s1, %s1175_s5  ;;  %p1182_p5 = scmp.lt.u32.totalorder %s1175_s5, %s1687_s1 }
  0x11   : > { %p1431_p11 = pnand %p1082_p9, %p1691_p1 }
  0x13   : > { %p1177_p13 = pneg %p1431_p11 }
  0x15   : > { %p1178_p0 = pnand %p1177_p13, %p1176_p12 }
  0x17   : > { %p1179_p3 = pneg %p1178_p0 }
  0x19   : > { %p1184_p7 = pnand %p1182_p5, %p1179_p3 }
  0x1b   : > { %1187 = shalt.err (!%p1184_p7)
}
  0x1c   : > { %s1188_s10 = scalar_lea.vmem %s1424_s25, 256  ;;  %p1196_p2 = scmp.lt.s32.totalorder %s1424_s25, %s1424_s25 }
  0x1d   : > { %p1189_p9 = scmp.ne.s32.totalorder %s1424_s25, %s1188_s10  ;;  %p1197_p12 = scmp.lt.s32.totalorder %s1188_s10, %s1188_s10 }
  0x1f   : > { %p1191_p10 = pnand %p1189_p9, %p1177_p13  ;;  %p1198_p0 = por %p1197_p12, %p1196_p2 }
  0x21   : > { %p1192_p1 = pneg %p1191_p10 }
  0x23   : > { %p1199_p6 = pnand %p1198_p0, %p1192_p1 }
  0x25   : > { %1202 = shalt.err (!%p1199_p6)
}
  0x26   : > { %s1335_s11 = smov 64   ;;  %s1336_s12 = smov 4  }
  0x27   : > { %1085 = dma.hbm_to_vmem [thread:$0]  (!%p1431_p11), %s1687_s1, 256, %s1424_s25, [#allocation7], %s1335_s11, %s1335_s11, %s1336_s12  }
  0x28   : > { %s1203_s27 = scalar_lea.hbm %s1688_s2, 256 }
  0x29   : > { %p1204_p2 = scmp.ne.s32.totalorder %s1688_s2, %s1203_s27  ;;  %p1210_p10 = scmp.lt.u32.totalorder %s1203_s27, %s1688_s2 }
  0x2b   : > { %p1206_p1 = pnand %p1204_p2, %p1177_p13 }
  0x2d   : > { %p1207_p6 = pneg %p1206_p1 }
  0x2f   : > { %p1212_p3 = pnand %p1210_p10, %p1207_p6 }
  0x31   : > { %1215 = shalt.err (!%p1212_p3)
}
  0x32   : > { %s1216_s25 = scalar_lea.vmem %s1435_s28, 256  ;;  %p1224_p12 = scmp.lt.s32.totalorder %s1435_s28, %s1435_s28 }
  0x33   : > { %p1217_p5 = scmp.ne.s32.totalorder %s1435_s28, %s1216_s25  ;;  %p1225_p0 = scmp.lt.s32.totalorder %s1216_s25, %s1216_s25 }
  0x35   : > { %p1219_p7 = pnand %p1217_p5, %p1177_p13  ;;  %p1226_p2 = por %p1225_p0, %p1224_p12 }
  0x37   : > { %p1220_p9 = pneg %p1219_p7 }
  0x39   : > { %p1227_p1 = pnand %p1226_p2, %p1220_p9 }
  0x3b   : > { %1230 = shalt.err (!%p1227_p1)
}
  0x3c   : > { %1088 = dma.hbm_to_vmem [thread:$0]  (!%p1431_p11), %s1688_s2, 256, %s1435_s28, [#allocation7], %s1335_s11, %s1335_s11, %s1336_s12  }
  0x3d   : > { %s1490_s9 = sadd.s32 1, %s1331_s18   ;;  %s28_s26 = sadd.s32 1, %s1327_s17 }
  0x3e   : > { %s25_s10 = ssub.s32 %s1331_s18, %s1490_s9  ;;  %p35_p13 = scmp.ne.s32.totalorder %s1327_s17, %s1323_s16 }
  0x3f   : > { %p26_p6 = scmp.eq.s32.totalorder %s25_s10, 0  ;;  %p36_p10 = scmp.eq.s32.totalorder %s1331_s18, 0 }
  0x40   : > { %p1698_p3 = scmp.eq.s32.totalorder %s1401_s19, 1  ;;  %p1099_p7 = scmp.lt.s32.totalorder %s1331_s18, 2 }
  0x41   : > { %s1506_s14 = scalar_select %p26_p6, %s1327_s17, %s28_s26  }
  0x42   : > { %p1500_p5 = por %p1698_p3, %p35_p13  ;;  %p37_p9 = por %p36_p10, %p35_p13 }
  0x43   : > { %s183_s20 = sand.u32 1, %s1327_s17   ;;  %s953_s28 = sshll.u32 %s1331_s18, 6 }
  0x44   : > { %s1699_s13 = scalar_select %p1500_p5, 1, 0 }
  0x45   : > { %s952_s24 = sshll.u32 %s183_s20, 2  ;;  %s1513_s27 = scalar_lea.hbm %s1686_s0, %s953_s28 }
  0x46   : > { %s187_s29 = scalar_lea.vmem [#allocation3], %s952_s24  ;;  %p1517_p11 = pnand %p1099_p7, %p37_p9 }
  0x47   : > { %s194_s30 = sshll.u32 %s187_s29, 4  ;;  %s184_s6 = scalar_lea.sflag [#allocation4], %s183_s20  ;;  %s1515_s30 = int_to_ptr.vmem [resolvable:$true] %s194_s30 }
  0x48   : > { %s1231_s25 = scalar_lea.hbm %s1513_s27, 64  ;;  %p1233_p0 = pneg %p1517_p11 }
  0x49   : > { %p1232_p12 = scmp.ne.s32.totalorder %s1513_s27, %s1231_s25  ;;  %s1236_s26 = scalar_lea.hbm %s1686_s0, 128 }
  0x4a   : > { %p1237_p13 = scmp.lt.u32.totalorder %s1513_s27, %s1686_s0  ;;  %p1238_p6 = scmp.lt.u32.totalorder %s1236_s26, %s1231_s25 }
  0x4b   : > { %p1234_p2 = pnand %p1233_p0, %p1232_p12  ;;  %p1240_p3 = scmp.lt.u32.totalorder %s1231_s25, %s1513_s27 }
  0x4c   : > { %p1239_p10 = por %p1238_p6, %p1237_p13 }
  0x4d   : > { %p1235_p1 = pneg %p1234_p2 }
  0x4e   : > { %p1241_p7 = por %p1240_p3, %p1239_p10 }
  0x50   : > { %p1242_p9 = pnand %p1241_p7, %p1235_p1 }
  0x52   : > { %1245 = shalt.err (!%p1242_p9)
}
  0x53   : > { %s1246_s20 = scalar_lea.vmem %s1515_s30, 64  ;;  %s1337_s28 = smov [#allocation3]  }
  0x54   : > { %p1247_p12 = scmp.ne.s32.totalorder %s1515_s30, %s1246_s20  ;;  %s1251_s11 = sshll.u32 %s1337_s28, 4  ;;  %s1252_s11 = int_to_ptr.vmem [resolvable:$false] %s1251_s11 }
  0x55   : > { %s1253_s12 = scalar_lea.vmem %s1252_s11, 128  ;;  %p1254_p4 = scmp.lt.s32.totalorder %s1515_s30, %s1252_s11 }
  0x56   : > { %p1249_p2 = pnand %p1247_p12, %p1233_p0  ;;  %p1255_p13 = scmp.lt.s32.totalorder %s1253_s12, %s1246_s20 }
  0x58   : > { %p1250_p5 = pneg %p1249_p2  ;;  %p1256_p6 = por %p1255_p13, %p1254_p4 }
  0x5a   : > { %p1257_p10 = pnand %p1256_p6, %p1250_p5 }
  0x5c   : > { %1260 = shalt.err (!%p1257_p10)
}
  0x5d   : > { %1092 = dma.hbm_to_vmem [thread:$0]  (!%p1517_p11), %s1513_s27, 64, %s1515_s30, %s184_s6  }
  0x5e   : > { %203 = sbr.rel (%p1420_p8) target bundleno = 1607 (0x647), region = 36  ;;  %s1549_s29 = sand.u32 (!%p1420_p8), 1, %s1323_s16  }
  0x5f   : > { %s955_s25 = sshll.u32 (!%p1420_p8), %s1549_s29, 2  ;;  %s206_s7 = scalar_lea.sflag (!%p1420_p8), [#allocation4], %s1549_s29 }
  0x60   : > { %s209_s8 = scalar_lea.vmem (!%p1420_p8), [#allocation3], %s955_s25  ;;  %p1701_p4 = scmp.ne.s32.totalorder (!%p1420_p8), %s1694_s21, 0 }
  0x65   : > { %1306 = dma.done.wait (%p1701_p4), %s206_s7, 64  }
  0x66   : > { %1308 = vsyncadd (%p1701_p4), %s206_s7, 4294967232  ;;  %p1702_p5 = scmp.eq.s32.totalorder %s1401_s19, 0 }
  0x68   : > { %1310 = dma.done.wait (%p1702_p5), [#allocation7], 512   ;;  %p1703_p11 = pmov %p1702_p5 }
  0x69   : > { %v1338_v0 = vmov 0.0   ;;  %vm1339_vm0 = vmmov 0   ;;  %v1155_v1 = vld [vmem:[#allocation6] sm:$0xff]   ;;  %v1156_v2 = vld [vmem:[#allocation6 + $0x8] sm:$0xff]   ;;  %v243_v3 = vld [vmem:[%s209_s8] sm:$0xf] }
  0x6a   : > { %1312 = vsyncadd (%p1703_p11), [#allocation7], 4294966784  ;;  %1006 = vmatprep.subr.bf16.mxu0 %v1338_v0  ;;  %1010 = vmatprep.mubr.msk.bf16.mxu0 %vm1339_vm0, %v1338_v0  ;;  %vm260_vm1 = vcmask 261120   ;;  %s1340_s21 = smov 120   ;;  %s1341_s23 = smov 96   ;;  %vm308_vm2 = vcmask 64512  }
  0x6b   : > { %1014 = vmatprep.subr.bf16.mxu1 %v1338_v0  ;;  %1016 = vmatprep.mubr.msk.bf16.mxu1 %vm1339_vm0, %v1338_v0  ;;  %s1342_s27 = smov 80   ;;  %s1343_s30 = smov 88   ;;  %vm372_vm3 = vcmask 1043456   ;;  %vm417_vm4 = vcmask 60416   ;;  %vm536_vm5 = vcmask 126016   ;;  %vm655_vm6 = vcmask 191616  }
  0x6c   : > { %1007 = vmatpush3.bf16.msra.mxu0 %v1155_v1  ;;  %s1344_s5 = smov 72   ;;  %s1345_s6 = smov 112   ;;  %vm774_vm7 = vcmask 257216  }
  0x6d   : > { %1008 = vmatprep.subr.bf16.mxu0 %v1338_v0  ;;  %s1346_s26 = smov 104   ;;  %s1347_s10 = smov 56  }
  0x6e   : > { %s1348_s24 = smov 64   ;;  %s1349_s20 = smov 40  }
  0x6f   : > { %s1350_s28 = smov 48   ;;  %s1351_s11 = smov 8  }
  0x70   : > { %1009 = vmatpush3.bf16.msra.mxu0 %v1156_v2  ;;  %s1352_s12 = smov 16   ;;  %s1353_s25 = smov 24  }
  0x71   : > { %1020 = vmatprep.subr.bf16.mxu0 %v1338_v0  ;;  %s958_s7 = sshll.u32 %s1549_s29, 3  ;;  %p1704_p0 = scmp.ne.s32.totalorder %s1699_s13, 0 }
  0x73   : > { %1011 = vmatmul.mubr.msk.bf16.vlgmr.msra.gmra.mrb[0].mxu0 %vm260_vm1, %v243_v3 }
  0x74   : > { %1022 = vmatprep.mubr.msk.bf16.mxu0 %vm1339_vm0, %v1338_v0 }
 0x146   : > { %v298_v4 = vpop.f32.mrb[0].mxu0 }
 0x147   : > { %v1572_v5 = vpack.c.bf16 %v298_v4, %v298_v4  ;;  %v1012_v6 = vpop.f32.mrb[1].mxu0 }
 0x148   : > { %v301_v7 = vpop.f32.mrb[2].mxu0 }
 0x149   : > { %419 = vrot.lane.b32.xlu1 %v1572_v5, %s1340_s21  ;;  %306 = vrot.lane.b32.xlu0 %v1572_v5, %s1341_s23  ;;  %v1013_v8 = vpop.f32.mrb[3].mxu0  ;;  %s978_s23 = sshll.u32 %s1401_s19, 7  ;;  %s845_s19 = scalar_lea.sflag [#allocation5], %s1549_s29 }
 0x14d   : > { %540 = vrot.lane.b32.xlu1 %v1572_v5, %s1342_s27  ;;  %421 = vrot.lane.b32.xlu0 %v1572_v5, %s1343_s30  ;;  %s241_s27 = scalar_lea.vmem [#allocation9], %s958_s7 }
 0x14e   : > { %s858_s30 = sshll.u32 %s241_s27, 4  ;;  %s1643_s30 = int_to_ptr.vmem [resolvable:$true] %s858_s30 }
 0x151   : > { %659 = vrot.lane.b32.xlu1 %v1572_v5, %s1344_s5  ;;  %538 = vrot.lane.b32.xlu0 %v1572_v5, %s1345_s6 }
 0x155   : > { %657 = vrot.lane.b32.xlu0 %v1572_v5, %s1346_s26  ;;  %s1641_s26 = scalar_lea.hbm %s1690_s4, %s978_s23 }
 0x1bb   : > { %v307_v9 = vpop.permute.xlu0 %306  ;;  %v420_v12 = vpop.permute.xlu1 %419 }
 0x1bc   : > { %v313_v10 = vsel %vm308_vm2, %v307_v9, 0 }
 0x1bd   : > { %1015 = vmatpush3.bf16.xpose.msra.mxu1 %v313_v10 }
 0x1be   : > { %1026 = vmatprep.subr.bf16.mxu1 %v1338_v0 }
 0x1bf   : > { %v422_v11 = vpop.permute.xlu0 %421  ;;  %v541_v14 = vpop.permute.xlu1 %540 }
 0x1c0   : > { %v427_v13 = vsel %vm308_vm2, %v422_v11, 0  ;;  %v546_v15 = vsel %vm308_vm2, %v541_v14, 0 }
 0x1c3   : > { %v660_v16 = vpop.permute.xlu1 %659  ;;  %v539_v17 = vpop.permute.xlu0 %538 }
 0x1c4   : > { %1017 = vmatmul.mubr.msk.bf16.vlgmr.msra.gmra.mrb[0].mxu1 %vm308_vm2, %v1572_v5  ;;  %v665_v18 = vsel %vm308_vm2, %v660_v16, 0 }
 0x1c5   : > { %1027 = vmatpush3.bf16.xpose.msra.mxu1 %v427_v13  ;;  %1028 = vmatprep.mubr.msk.bf16.mxu1 %vm1339_vm0, %v1338_v0 }
 0x1c6   : > { %1038 = vmatprep.subr.bf16.mxu1 %v1338_v0 }
 0x1c7   : > { %v658_v19 = vpop.permute.xlu0 %657 }
 0x1cc   : > { %1029 = vmatmul.mubr.msk.bf16.vlgmr.msra.gmra.mrb[4].mxu1 %vm308_vm2, %v420_v12 }
 0x1cd   : > { %1039 = vmatpush3.bf16.xpose.msra.mxu1 %v546_v15  ;;  %1040 = vmatprep.mubr.msk.bf16.mxu1 %vm1339_vm0, %v1338_v0 }
 0x1ce   : > { %1050 = vmatprep.subr.bf16.mxu1 %v1338_v0 }
 0x1d4   : > { %1041 = vmatmul.mubr.msk.bf16.vlgmr.msra.gmra.mrb[8].mxu1 %vm308_vm2, %v539_v17 }
 0x1d5   : > { %1051 = vmatpush3.bf16.xpose.msra.mxu1 %v665_v18  ;;  %1052 = vmatprep.mubr.msk.bf16.mxu1 %vm1339_vm0, %v1338_v0 }
 0x1d6   : > { %1062 = vmatprep.subr.bf16.mxu1 %v1338_v0 }
 0x1dc   : > { %1053 = vmatmul.mubr.msk.bf16.vlgmr.msra.gmra.mrb[12].mxu1 %vm308_vm2, %v658_v19 }
 0x1dd   : > { %1066 = vmatprep.mubr.msk.bf16.mxu1 %vm1339_vm0, %v1338_v0 }
 0x297   : > { %v349_v20 = vpop.f32.mrb[0].mxu1 }
 0x298   : > { %v1018_v21 = vpop.f32.mrb[1].mxu1  ;;  %v355_v22 = vsel %vm308_vm2, %v349_v20, -inf }
 0x299   : > { %356 = vmax.xlane.f32.xlu1 %v355_v22  ;;  %v352_v23 = vpop.f32.mrb[2].mxu1 }
 0x29a   : > { %v1019_v24 = vpop.f32.mrb[3].mxu1 }
 0x29f   : > { %v463_v25 = vpop.f32.mrb[4].mxu1 }
 0x2a0   : > { %v1030_v26 = vpop.f32.mrb[5].mxu1  ;;  %v469_v27 = vsel %vm308_vm2, %v463_v25, -inf }
 0x2a1   : > { %470 = vmax.xlane.f32.xlu0 %v469_v27  ;;  %v466_v28 = vpop.f32.mrb[6].mxu1 }
 0x2a2   : > { %v1031_v29 = vpop.f32.mrb[7].mxu1 }
 0x2a7   : > { %v582_v30 = vpop.f32.mrb[8].mxu1 }
 0x2a8   : > { %v1042_v31 = vpop.f32.mrb[9].mxu1  ;;  %v588_v32 = vsel %vm308_vm2, %v582_v30, -inf }
 0x2a9   : > { %589 = vmax.xlane.f32.xlu0 %v588_v32  ;;  %v585_v33 = vpop.f32.mrb[10].mxu1  ;;  %v1157_v31 = vld [vmem:[#allocation8] sm:$0xff]   ;;  %v1158_v32 = vld [vmem:[#allocation8 + $0x8] sm:$0xff]  }
 0x2aa   : > { %v1043_v34 = vpop.f32.mrb[11].mxu1  ;;  %1063 = vmatpush3.bf16.msra.mxu1 %v1157_v31 }
 0x2ab   : > { %1064 = vmatprep.subr.bf16.mxu1 %v1338_v0 }
 0x2ae   : > { %1065 = vmatpush3.bf16.msra.mxu1 %v1158_v32 }
 0x2af   : > { %v701_v35 = vpop.f32.mrb[12].mxu1 }
 0x2b0   : > { %v1054_v36 = vpop.f32.mrb[13].mxu1  ;;  %v707_v37 = vsel %vm308_vm2, %v701_v35, -inf }
 0x2b1   : > { %708 = vmax.xlane.f32.xlu1 %v707_v37  ;;  %v704_v38 = vpop.f32.mrb[14].mxu1 }
 0x2b2   : > { %v1055_v39 = vpop.f32.mrb[15].mxu1 }
 0x326   : > { %v357_v40 = vpop.xlane.xlu1 %356 }
 0x327   : > { %v358_v41 = vsub.f32 %v349_v20, %v357_v40 }
 0x329   : > { %v359_v42 = vmul.f32 1.442695, %v358_v41 }
 0x32b   : > { %1159 = vpow2.f32 %v359_v42 }
 0x32e   : > { %v471_v43 = vpop.xlane.xlu0 %470 }
 0x32f   : > { %v472_v44 = vsub.f32 %v463_v25, %v471_v43 }
 0x331   : > { %v473_v45 = vmul.f32 1.442695, %v472_v44 }
 0x333   : > { %1161 = vpow2.f32 %v473_v45 }
 0x335   : > { %v1160_v46 = vpop.eup %1159 }
 0x336   : > { %v590_v47 = vpop.xlane.xlu0 %589  ;;  %v361_v48 = vsel %vm308_vm2, %v1160_v46, 0.0 }
 0x337   : > { %v591_v49 = vsub.f32 %v582_v30, %v590_v47  ;;  %362 = vadd.xlane.f32.xlu0 %v361_v48 }
 0x339   : > { %v592_v50 = vmul.f32 1.442695, %v591_v49 }
 0x33b   : > { %1163 = vpow2.f32 %v592_v50 }
 0x33d   : > { %v1162_v51 = vpop.eup %1161 }
 0x33e   : > { %v475_v52 = vsel %vm308_vm2, %v1162_v51, 0.0  ;;  %v709_v55 = vpop.xlane.xlu1 %708 }
 0x33f   : > { %476 = vadd.xlane.f32.xlu1 %v475_v52  ;;  %v710_v56 = vsub.f32 %v701_v35, %v709_v55 }
 0x341   : > { %v711_v57 = vmul.f32 1.442695, %v710_v56 }
 0x343   : > { %1165 = vpow2.f32 %v711_v57 }
 0x345   : > { %v1164_v53 = vpop.eup %1163 }
 0x346   : > { %v594_v54 = vsel %vm308_vm2, %v1164_v53, 0.0 }
 0x347   : > { %595 = vadd.xlane.f32.xlu0 %v594_v54 }
 0x34d   : > { %v1166_v58 = vpop.eup %1165 }
 0x34e   : > { %v713_v59 = vsel %vm308_vm2, %v1166_v58, 0.0 }
 0x350   : > { %481 = vrot.lane.b32.xlu1 %v1572_v5, %s1347_s10  ;;  %s1261_s10 = scalar_lea.vmem %s1643_s30, 128 }
 0x351   : > { %p1262_p8 = scmp.ne.s32.totalorder %s1643_s30, %s1261_s10 }
 0x353   : > { %p1263_p1 = pnand %p1262_p8, %p1704_p0 }
 0x355   : > { %p1264_p3 = pneg %p1263_p1 }
 0x35d   : > { %367 = vrot.lane.b32.xlu0 %v1572_v5, %s1348_s24  ;;  %s1354_s24 = smov [#allocation9]  }
 0x361   : > { %719 = vrot.lane.b32.xlu0 %v1572_v5, %s1349_s20  ;;  %s1265_s20 = sshll.u32 %s1354_s24, 4  ;;  %s1266_s20 = int_to_ptr.vmem [resolvable:$false] %s1265_s20 }
 0x362   : > { %p1268_p7 = scmp.lt.s32.totalorder %s1643_s30, %s1266_s20 }
 0x374   : > { %714 = vadd.xlane.f32.xlu1 %v713_v59 }
 0x385   : > { %600 = vrot.lane.b32.xlu1 %v1572_v5, %s1350_s28  ;;  %s1267_s28 = scalar_lea.vmem %s1266_s20, 256 }
 0x386   : > { %p1269_p9 = scmp.lt.s32.totalorder %s1267_s28, %s1261_s10 }
 0x388   : > { %p1270_p12 = por %p1269_p9, %p1268_p7 }
 0x38a   : > { %p1271_p2 = pnand %p1270_p12, %p1264_p3 }
 0x3c4   : > { %v363_v60 = vpop.xlane.xlu0 %362 }
 0x3c5   : > { %1167 = vrcp.f32 %v363_v60 }
 0x3cc   : > { %v477_v61 = vpop.xlane.xlu1 %476 }
 0x3cd   : > { %1169 = vrcp.f32 %v477_v61 }
 0x3cf   : > { %v1168_v62 = vpop.eup %1167 }
 0x3d0   : > { %v365_v1 = vmul.f32 %v1168_v62, %v1160_v46  ;;  %v482_v4 = vpop.permute.xlu1 %481  ;;  %v973_v46 = vld [vmem:[%s1689_s3] ss:$0 sm:$0xff] }
 0x3d1   : > { %v487_v8 = vsel %vm372_vm3, %v482_v4, 0 }
 0x3d2   : > { %v366_v6 = vpack.c.bf16 %v365_v1, %v365_v1 }
 0x3d4   : > { %v596_v63 = vpop.xlane.xlu0 %595 }
 0x3d5   : > { %1171 = vrcp.f32 %v596_v63 }
 0x3d7   : > { %v1170_v7 = vpop.eup %1169 }
 0x3d8   : > { %v368_v2 = vpop.permute.xlu0 %367  ;;  %v479_v5 = vmul.f32 %v1170_v7, %v1162_v51 }
 0x3d9   : > { %v374_v3 = vsel %vm372_vm3, %v368_v2, 0 }
 0x3da   : > { %1021 = vmatpush3.bf16.msra.mxu0 %v374_v3  ;;  %v480_v9 = vpack.c.bf16 %v479_v5, %v479_v5 }
 0x3db   : > { %1032 = vmatprep.subr.bf16.mxu0 %v1338_v0 }
 0x3dc   : > { %v720_v15 = vpop.permute.xlu0 %719 }
 0x3dd   : > { %1023 = vmatmul.mubr.msk.bf16.vlgmr.msra.gmra.mrb[4].mxu0 %vm308_vm2, %v366_v6  ;;  %v725_v17 = vsel %vm372_vm3, %v720_v15, 0 }
 0x3de   : > { %1033 = vmatpush3.bf16.msra.mxu0 %v487_v8  ;;  %1034 = vmatprep.mubr.msk.bf16.mxu0 %vm1339_vm0, %v1338_v0 }
 0x3df   : > { %1044 = vmatprep.subr.bf16.mxu0 %v1338_v0  ;;  %v1172_v10 = vpop.eup %1171 }
 0x3e0   : > { %v598_v12 = vmul.f32 %v1172_v10, %v1164_v53 }
 0x3e2   : > { %v599_v16 = vpack.c.bf16 %v598_v12, %v598_v12 }
 0x3e5   : > { %1035 = vmatmul.mubr.msk.bf16.vlgmr.msra.gmra.mrb[8].mxu0 %vm308_vm2, %v480_v9 }
 0x3e6   : > { %1046 = vmatprep.mubr.msk.bf16.mxu0 %vm1339_vm0, %v1338_v0 }
 0x401   : > { %v715_v11 = vpop.xlane.xlu1 %714 }
 0x402   : > { %1173 = vrcp.f32 %v715_v11 }
 0x405   : > { %v601_v13 = vpop.permute.xlu1 %600 }
 0x406   : > { %v606_v14 = vsel %vm372_vm3, %v601_v13, 0 }
 0x407   : > { %1045 = vmatpush3.bf16.msra.mxu0 %v606_v14 }
 0x408   : > { %1056 = vmatprep.subr.bf16.mxu0 %v1338_v0 }
 0x40a   : > { %1047 = vmatmul.mubr.msk.bf16.vlgmr.msra.gmra.mrb[12].mxu0 %vm308_vm2, %v599_v16 }
 0x40b   : > { %1057 = vmatpush3.bf16.msra.mxu0 %v725_v17  ;;  %1058 = vmatprep.mubr.msk.bf16.mxu0 %vm1339_vm0, %v1338_v0 }
 0x40c   : > { %v1174_v18 = vpop.eup %1173 }
 0x40d   : > { %v717_v19 = vmul.f32 %v1174_v18, %v1166_v58 }
 0x40f   : > { %v718_v20 = vpack.c.bf16 %v717_v19, %v717_v19 }
 0x412   : > { %1059 = vmatmul.mubr.msk.bf16.vlgmr.msra.gmra.mrb[16].mxu0 %vm308_vm2, %v718_v20 }
 0x4b0   : > { %v410_v21 = vpop.f32.mrb[4].mxu0 }
 0x4b1   : > { %v416_v22 = vpack.c.bf16 %v410_v21, %v410_v21  ;;  %v1024_v23 = vpop.f32.mrb[5].mxu0 }
 0x4b2   : > { %v413_v24 = vpop.f32.mrb[6].mxu0 }
 0x4b3   : > { %418 = vst.msk [vmem:[#allocation2] sm:$0xf] %vm417_vm4, %v416_v22  ;;  %v1025_v25 = vpop.f32.mrb[7].mxu0 }
 0x4b8   : > { %v523_v26 = vpop.f32.mrb[8].mxu0 }
 0x4b9   : > { %v981_v27 = vpack.c.bf16 %v523_v26, %v523_v26  ;;  %v1036_v28 = vpop.f32.mrb[9].mxu0 }
 0x4ba   : > { %v526_v29 = vpop.f32.mrb[10].mxu0 }
 0x4bb   : > { %533 = vrot.lane.b32.xlu1 %v981_v27, %s1351_s11  ;;  %v1037_v30 = vpop.f32.mrb[11].mxu0 }
 0x4dd   : > { %v642_v33 = vpop.f32.mrb[12].mxu0 }
 0x4de   : > { %v982_v34 = vpack.c.bf16 %v642_v33, %v642_v33  ;;  %v1048_v35 = vpop.f32.mrb[13].mxu0 }
 0x4df   : > { %v645_v36 = vpop.f32.mrb[14].mxu0 }
 0x4e0   : > { %652 = vrot.lane.b32.xlu0 %v982_v34, %s1352_s12  ;;  %v1049_v37 = vpop.f32.mrb[15].mxu0 }
 0x4e5   : > { %v761_v38 = vpop.f32.mrb[16].mxu0 }
 0x4e6   : > { %v983_v39 = vpack.c.bf16 %v761_v38, %v761_v38  ;;  %v1060_v40 = vpop.f32.mrb[17].mxu0 }
 0x4e7   : > { %v764_v41 = vpop.f32.mrb[18].mxu0 }
 0x4e8   : > { %771 = vrot.lane.b32.xlu1 %v983_v39, %s1353_s25  ;;  %v1061_v42 = vpop.f32.mrb[19].mxu0 }
 0x52d   : > { %v534_v43 = vpop.permute.xlu1 %533 }
 0x52e   : > { %537 = vst.msk [vmem:[#allocation2] sm:$0xf] %vm536_vm5, %v534_v43 }
 0x552   : > { %v653_v0 = vpop.permute.xlu0 %652 }
 0x553   : > { %656 = vst.msk [vmem:[#allocation2] sm:$0xf] %vm655_vm6, %v653_v0 }
 0x55a   : > { %v772_v44 = vpop.permute.xlu1 %771 }
 0x55b   : > { %775 = vst.msk [vmem:[#allocation2] sm:$0xf] %vm774_vm7, %v772_v44 }
 0x562   : > { %v776_v45 = vld [vmem:[#allocation2] sm:$0xf] }
 0x563   : > { %1067 = vmatmul.mubr.msk.bf16.vlgmr.msra.gmra.mrb[16].mxu1 %vm260_vm1, %v776_v45 }
 0x636   : > { %v837_v47 = vpop.f32.mrb[16].mxu1 }
 0x637   : > { %v838_v48 = vadd.f32 %v973_v46, %v837_v47  ;;  %v1068_v49 = vpop.f32.mrb[17].mxu1 }
 0x638   : > { %v840_v50 = vpop.f32.mrb[18].mxu1 }
 0x639   : > { %v1069_v51 = vpop.f32.mrb[19].mxu1  ;;  %843 = vst.msk [vmem:[%s241_s27] sm:$0xff] %vm260_vm1, %v838_v48 }
 0x63a   : > { %1274 = shalt.err (!%p1271_p2)
}
 0x63b   : > { %s1275_s29 = scalar_lea.hbm %s1641_s26, 128  ;;  %s1279_s25 = scalar_lea.hbm %s1690_s4, 256 }
 0x63c   : > { %p1276_p13 = scmp.ne.s32.totalorder %s1641_s26, %s1275_s29  ;;  %p1280_p4 = scmp.lt.u32.totalorder %s1641_s26, %s1690_s4 }
 0x63d   : > { %p1281_p5 = scmp.lt.u32.totalorder %s1279_s25, %s1275_s29  ;;  %p1283_p8 = scmp.lt.u32.totalorder %s1275_s29, %s1641_s26 }
 0x63e   : > { %p1277_p6 = pnand %p1276_p13, %p1704_p0 }
 0x63f   : > { %p1282_p11 = por %p1281_p5, %p1280_p4 }
 0x640   : > { %p1278_p10 = pneg %p1277_p6 }
 0x641   : > { %p1284_p1 = por %p1283_p8, %p1282_p11 }
 0x643   : > { %p1285_p3 = pnand %p1284_p1, %p1278_p10 }
 0x645   : > { %1288 = shalt.err (!%p1285_p3)
}
 0x646   : > { %1080 = dma.vmem_to_hbm [thread:$0]  (%p1704_p0), %s1643_s30, 128, %s1641_s26, %s845_s19  }
 0x647 PF: > { %s870_s21 = sand.u32 1, %s1319_s15   ;;  %p1705_p7 = scmp.ne.s32.totalorder %s1695_s22, 0 }
 0x648   : > { %p1706_p9 = scmp.ge.s32.totalorder %s1331_s18, 2  ;;  %s871_s23 = scalar_lea.sflag [#allocation5], %s870_s21 }
 0x64a   : > { %p1094_p12 = pnand %p1706_p9, %p1705_p7 }
 0x64c   : > { %1314 = dma.done.wait (!%p1094_p12), %s871_s23, 128  }
 0x64d   : > { %1316 = vsyncadd (!%p1094_p12), %s871_s23, 4294967168  ;;  %p18_p2 = scmp.ge.s32.totalorder %s1490_s9, 4   ;;  %s1707_s15 = smov %s1323_s16 }
 0x64e   : > { %s1708_s16 = smov %s1327_s17  ;;  %s1709_s17 = smov %s1506_s14 }
 0x64f   : > { %s1710_s18 = smov %s1490_s9  ;;  %20 = sbr.rel (!%p18_p2) target bundleno = 6 (0x6), region = 89 }
 0x656   :  { %876 = vsyncpa [#allocation4], 1 }
 0x657   :  { %878 = vsyncpa [#allocation4 + $0x1], 1 }
 0x658   :  { %879 = vsyncpa [#allocation7], 1 }
 0x659   :  { %880 = vsyncpa [#allocation5], 1 }
 0x65a   :  { %882 = vsyncpa [#allocation5 + $0x1], 1 }

</bundles_post_ra>
